<compile_context>
chip_gen: v7x
topology: tpu7x:2x2x1
jax: 0.10.0
libtpu: 0.0.40
codegen_flags: <defaults>
</compile_context>

<pallas_src>
import jax
import jax.numpy as jnp
import numpy as np
from jax.experimental import pallas as pl
from jax.experimental.pallas import tpu as pltpu


def _vq_kernel(e_ref, e2h_ref, x_ref, q_ref, idx_ref, loss_ref):
    """One grid step: quantize a (BB, D, TT) lane-dense slab of inputs."""
    e = e_ref[...]                      # (K, D)  resident f32 codebook
    e2h = e2h_ref[...]                  # (K, 1)  resident 0.5*||e_k||^2
    num_k = e.shape[0]
    bb = x_ref.shape[0]

    def body(b, carry):
        x = x_ref[b].astype(jnp.float32)                             # (D, TT)

        # scores[k, t] = 0.5*||e_k||^2 - e_k . x_t  (same argmin as full sq-dist;
        # ||x||^2 never computed).  Score matmul at DEFAULT precision: ordering only.
        xe = jax.lax.dot_general(e, x, (((1,), (0,)), ((), ())),
                                 preferred_element_type=jnp.float32)  # (K, TT) MXU
        scores = e2h - xe

        # First-occurrence argmin over K (matches torch.argmin) via min + iota.
        k_iota = jax.lax.broadcasted_iota(jnp.int32, scores.shape, 0)  # (K, TT)
        min_s = jnp.min(scores, axis=0, keepdims=True)                 # (1, TT)
        idx = jnp.min(jnp.where(scores == min_s, k_iota, num_k),
                      axis=0, keepdims=True)                           # (1, TT) int32
        idx_ref[b] = idx                                               # lane-dense store

        # One-hot gather through the MXU pinned to HIGHEST -> exact codebook rows.
        onehot = (k_iota == idx).astype(jnp.float32)                   # (K, TT)
        q = jax.lax.dot_general(e, onehot, (((0,), (0,)), ((), ())),
                                preferred_element_type=jnp.float32,
                                precision=jax.lax.Precision.HIGHEST)   # (D, TT)
        q_ref[b] = q.astype(q_ref.dtype)

        # Per-position squared error: reduce over D (sublanes) only, stay lane-dense.
        diff = q - x
        loss_ref[b] = jnp.sum(diff * diff, axis=0, keepdims=True)      # (1, TT)
        return carry

    jax.lax.fori_loop(0, bb, body, 0)


def _vmem_capacity_bytes():
    try:
        info = pltpu.get_tpu_info()
        cap = getattr(info, "vmem_capacity_bytes", None)
        if cap:
            return int(cap)
    except Exception:
        pass
    return 64 * 1024 * 1024        # conservative default: v7x per-TensorCore VMEM


def _plan_tiling(batch, d, k, hw_pad):
    """Pick (BB batch rows, TT spatial lanes) per grid step and a VMEM limit."""
    vmem_cap = _vmem_capacity_bytes()
    budget = min(vmem_cap // 2, 40 * 1024 * 1024)   # leave room for compiler scratch
    slab_cap = 4 * 1024 * 1024                      # per-step x-slab cap (>> 512 KiB knee)

    tt_cands = sorted({t for t in (hw_pad, 8192, 4096, 2048, 1024, 512, 256, 128)
                       if t <= hw_pad and hw_pad % t == 0}, reverse=True)
    bb_cands = sorted({b for b in range(1, batch + 1) if batch % b == 0}, reverse=True)

    def footprint(bb, tt):
        slab = bb * d * tt * 4                              # one f32 (BB, D, TT) slab
        io = 2 * (2 * slab) + 2 * (2 * bb * tt * 4)         # x,q double-buffered; idx,loss
        resident = 2 * k * (d + 1) * 4                      # codebook + bias buffers
        interm = (3 * k + 3 * d) * tt * 4                   # per-image intermediates headroom
        return io + resident + interm

    choice = None
    for tt in tt_cands:                 # larger spatial tiles first
        for bb in bb_cands:             # fold as many batch rows as fit
            if bb * d * tt * 4 <= slab_cap and footprint(bb, tt) <= budget:
                choice = (bb, tt)
                break
        if choice is not None:
            break
    if choice is None:
        choice = (1, tt_cands[-1])      # smallest legal lane-dense tile
    bb, tt = choice

    vmem_limit = int(min(int(vmem_cap * 0.9),
                         max(32 * 1024 * 1024, footprint(bb, tt) + 16 * 1024 * 1024)))
    return bb, tt, vmem_limit


def vector_quantizer_forward(x_nchw, embeddings, commitment_cost):
    """Training-mode forward of VectorQuantizer.

    Returns (quantized_nchw, loss, encoding_indices).  The straight-through
    estimator's forward value equals `quantized`.
    """
    B, C, H, W = x_nchw.shape
    K, D = embeddings.shape
    assert C == D, "channel dim must equal embedding_dim"
    HW = H * W
    HW_pad = -(-HW // 128) * 128

    x_flat = x_nchw.reshape(B, D, HW)                        # zero-copy NCHW view
    if HW_pad != HW:
        # Pad spatial axis to a lane multiple: keeps all blocks/stores lane-dense.
        x_flat = jnp.pad(x_flat, ((0, 0), (0, 0), (0, HW_pad - HW)))

    e32 = embeddings.astype(jnp.float32)
    e2h = 0.5 * jnp.sum(e32 * e32, axis=1, keepdims=True)    # (K, 1), hoisted

    BB, TT, vmem_limit = _plan_tiling(B, D, K, HW_pad)
    G = HW_pad // TT

    q_out, idx_out, loss_pp = pl.pallas_call(
        _vq_kernel,
        grid=(B // BB, G),
        in_specs=[
            pl.BlockSpec((K, D), lambda i, s: (0, 0)),            # resident codebook
            pl.BlockSpec((K, 1), lambda i, s: (0, 0)),            # resident 0.5*||e||^2
            pl.BlockSpec((BB, D, TT), lambda i, s: (i, 0, s)),    # x slab, BB batch rows
        ],
        out_specs=(
            pl.BlockSpec((BB, D, TT), lambda i, s: (i, 0, s)),    # quantized slab
            pl.BlockSpec((BB, 1, TT), lambda i, s: (i, 0, s)),    # indices (lane-dense)
            pl.BlockSpec((BB, 1, TT), lambda i, s: (i, 0, s)),    # per-position sq-err
        ),
        out_shape=(
            jax.ShapeDtypeStruct((B, D, HW_pad), x_nchw.dtype),
            jax.ShapeDtypeStruct((B, 1, HW_pad), jnp.int32),
            jax.ShapeDtypeStruct((B, 1, HW_pad), jnp.float32),
        ),
        compiler_params=pltpu.CompilerParams(
            dimension_semantics=("parallel", "parallel"),
            vmem_limit_bytes=vmem_limit,
        ),
    )(e32, e2h, x_flat)

    quantized_nchw = q_out[:, :, :HW].reshape(B, D, H, W)    # already channels-first
    indices = idx_out[:, 0, :HW].reshape(-1)                 # (B*H*W,), NHWC row order
    sq_err = jnp.sum(loss_pp[:, 0, :HW])
    mse = sq_err / jnp.float32(B * HW * D)
    loss = (1.0 + commitment_cost) * mse                     # q_latent + beta * e_latent
    return quantized_nchw, loss, indices


def _reference_forward(x_nchw, embeddings, commitment_cost):
    """Pure-JAX reference mirroring the PyTorch module (training mode)."""
    B, C, H, W = x_nchw.shape
    x = jnp.transpose(x_nchw, (0, 2, 3, 1))
    flat_x = x.reshape(-1, C)
    dist = (jnp.sum(flat_x ** 2, axis=1, keepdims=True)
            + jnp.sum(embeddings ** 2, axis=1)
            - 2.0 * flat_x @ embeddings.T)
    idx = jnp.argmin(dist, axis=1)
    quantized = embeddings[idx].reshape(x.shape)
    mse = jnp.mean((quantized - x) ** 2)
    loss = mse + commitment_cost * mse
    quantized_nchw = jnp.transpose(quantized, (0, 3, 1, 2))
    return quantized_nchw, loss, idx


if __name__ == "__main__":
    # Module config: embedding_dim=32, num_embeddings=64, commitment_cost=0.25
    B, D, H, W = 2, 32, 16, 16
    K = 64
    beta = 0.25

    key = jax.random.PRNGKey(0)
    kx, ke = jax.random.split(key)
    x = jax.random.normal(kx, (B, D, H, W), dtype=jnp.float32)     # NCHW input
    embeddings = jax.random.normal(ke, (K, D), dtype=jnp.float32)  # nn.Embedding ~ N(0,1)

    q, loss, idx = vector_quantizer_forward(x, embeddings, beta)
    jax.block_until_ready((q, loss, idx))

    q_ref, loss_ref, idx_ref = _reference_forward(x, embeddings, beta)
    np.testing.assert_allclose(np.asarray(q), np.asarray(q_ref), rtol=1e-5, atol=1e-5)
    np.testing.assert_allclose(np.asarray(loss), np.asarray(loss_ref), rtol=1e-5, atol=1e-5)
    np.testing.assert_array_equal(np.asarray(idx), np.asarray(idx_ref))

    print("KERNEL_OK")
</pallas_src>

<mosaic_0001>
module attributes {stable_mosaic.version = 11 : i64} {
  func.func @_vq_kernel(%arg0: i32, %arg1: i32, %arg2: memref<64x32xf32, #tpu.memory_space<vmem>>, %arg3: memref<64x1xf32, #tpu.memory_space<vmem>>, %arg4: memref<2x32x256xf32, #tpu.memory_space<vmem>>, %arg5: memref<2x32x256xf32, #tpu.memory_space<vmem>>, %arg6: memref<2x1x256xi32, #tpu.memory_space<vmem>>, %arg7: memref<2x1x256xf32, #tpu.memory_space<vmem>>) attributes {dimension_semantics = [#tpu.dimension_semantics<parallel>, #tpu.dimension_semantics<parallel>], iteration_bounds = array<i64: 1, 1>, scalar_prefetch = 0 : i64, scratch_operands = 0 : i64, tpu.core_type = #tpu.core_type<tc>, window_params = [{pipeline_mode = #tpu.pipeline_mode<synchronous>, transform_indices = @transform_0, window_bounds = array<i64: 64, 32>}, {pipeline_mode = #tpu.pipeline_mode<synchronous>, transform_indices = @transform_1, window_bounds = array<i64: 64, 1>}, {transform_indices = @transform_2, window_bounds = array<i64: 2, 32, 256>}, {transform_indices = @transform_3, window_bounds = array<i64: 2, 32, 256>}, {transform_indices = @transform_4, window_bounds = array<i64: 2, 1, 256>}, {transform_indices = @transform_5, window_bounds = array<i64: 2, 1, 256>}]} {
    %c0 = arith.constant 0 : index
    %c0_0 = arith.constant 0 : index
    %0 = vector.load %arg2[%c0, %c0_0] : memref<64x32xf32, #tpu.memory_space<vmem>>, vector<64x32xf32>
    %c0_1 = arith.constant 0 : index
    %c0_2 = arith.constant 0 : index
    %1 = vector.load %arg3[%c0_1, %c0_2] : memref<64x1xf32, #tpu.memory_space<vmem>>, vector<64x1xf32>
    %c0_i32 = arith.constant 0 : i32
    %c2_i32 = arith.constant 2 : i32
    %2 = arith.addi %c0_i32, %c2_i32 : i32
    %c1_i32 = arith.constant 1 : i32
    scf.for %arg8 = %c0_i32 to %2 step %c1_i32  : i32 {
      %3 = arith.index_cast %arg8 : i32 to index
      %c0_4 = arith.constant 0 : index
      %c0_5 = arith.constant 0 : index
      %4 = vector.load %arg4[%3, %c0_4, %c0_5] : memref<2x32x256xf32, #tpu.memory_space<vmem>>, vector<1x32x256xf32>
      %5 = vector.shape_cast %4 : vector<1x32x256xf32> to vector<32x256xf32>
      %cst = arith.constant dense<0.000000e+00> : vector<64x256xf32>
      %6 = tpu.matmul %0, %5, %cst {dimension_numbers = #tpu.dot_dimension_numbers<[1], [0], [0], [1], [0, 0, 1, 1], [], []>} : vector<64x32xf32>, vector<32x256xf32>, vector<64x256xf32> -> vector<64x256xf32>
      %7 = vector.broadcast %1 : vector<64x1xf32> to vector<64x256xf32>
      %8 = arith.subf %7, %6 : vector<64x256xf32>
      %9 = tpu.iota {dimensions = array<i32: 0>} : vector<64x256xi32>
      %cst_6 = arith.constant dense<0x7F800000> : vector<256xf32>
      %10 = vector.multi_reduction <minimumf>, %8, %cst_6 [0] : vector<64x256xf32> to vector<256xf32>
      %11 = vector.shape_cast %10 : vector<256xf32> to vector<1x256xf32>
      %12 = vector.broadcast %11 : vector<1x256xf32> to vector<64x256xf32>
      %13 = arith.cmpf oeq, %8, %12 : vector<64x256xf32>
      %c64_i32 = arith.constant 64 : i32
      %14 = vector.broadcast %c64_i32 : i32 to vector<64x256xi32>
      %15 = arith.select %13, %9, %14 : vector<64x256xi1>, vector<64x256xi32>
      %cst_7 = arith.constant dense<2147483647> : vector<256xi32>
      %16 = vector.multi_reduction <minsi>, %15, %cst_7 [0] : vector<64x256xi32> to vector<256xi32>
      %17 = vector.shape_cast %16 : vector<256xi32> to vector<1x256xi32>
      %18 = arith.index_cast %arg8 : i32 to index
      %c0_8 = arith.constant 0 : index
      %c0_9 = arith.constant 0 : index
      %19 = vector.load %arg6[%18, %c0_8, %c0_9] : memref<2x1x256xi32, #tpu.memory_space<vmem>>, vector<1x1x256xi32>
      %20 = vector.shape_cast %19 : vector<1x1x256xi32> to vector<1x256xi32>
      %21 = vector.shape_cast %17 : vector<1x256xi32> to vector<1x1x256xi32>
      tpu.vector_store %arg6[%18, %c0_8, %c0_9], %21 {strides = array<i32>} : memref<2x1x256xi32, #tpu.memory_space<vmem>>, vector<1x1x256xi32>,
      %22 = vector.broadcast %17 : vector<1x256xi32> to vector<64x256xi32>
      %23 = arith.cmpi eq, %9, %22 : vector<64x256xi32>
      %24 = arith.extui %23 : vector<64x256xi1> to vector<64x256xi32>
      %25 = arith.sitofp %24 : vector<64x256xi32> to vector<64x256xf32>
      %cst_10 = arith.constant dense<0.000000e+00> : vector<32x256xf32>
      %26 = tpu.matmul %0, %25, %cst_10 {dimension_numbers = #tpu.dot_dimension_numbers<[0], [0], [1], [1], [0, 1, 1, 1], [], []>, precision = #tpu.contract_precision<fp32>} : vector<64x32xf32>, vector<64x256xf32>, vector<32x256xf32> -> vector<32x256xf32>
      %27 = arith.index_cast %arg8 : i32 to index
      %c0_11 = arith.constant 0 : index
      %c0_12 = arith.constant 0 : index
      %28 = vector.load %arg5[%27, %c0_11, %c0_12] : memref<2x32x256xf32, #tpu.memory_space<vmem>>, vector<1x32x256xf32>
      %29 = vector.shape_cast %28 : vector<1x32x256xf32> to vector<32x256xf32>
      %30 = vector.shape_cast %26 : vector<32x256xf32> to vector<1x32x256xf32>
      tpu.vector_store %arg5[%27, %c0_11, %c0_12], %30 {strides = array<i32>} : memref<2x32x256xf32, #tpu.memory_space<vmem>>, vector<1x32x256xf32>,
      %31 = arith.subf %26, %5 : vector<32x256xf32>
      %32 = arith.mulf %31, %31 : vector<32x256xf32>
      %cst_13 = arith.constant dense<0.000000e+00> : vector<256xf32>
      %33 = vector.multi_reduction <add>, %32, %cst_13 [0] : vector<32x256xf32> to vector<256xf32>
      %34 = vector.shape_cast %33 : vector<256xf32> to vector<1x256xf32>
      %35 = arith.index_cast %arg8 : i32 to index
      %c0_14 = arith.constant 0 : index
      %c0_15 = arith.constant 0 : index
      %36 = vector.load %arg7[%35, %c0_14, %c0_15] : memref<2x1x256xf32, #tpu.memory_space<vmem>>, vector<1x1x256xf32>
      %37 = vector.shape_cast %36 : vector<1x1x256xf32> to vector<1x256xf32>
      %38 = vector.shape_cast %34 : vector<1x256xf32> to vector<1x1x256xf32>
      tpu.vector_store %arg7[%35, %c0_14, %c0_15], %38 {strides = array<i32>} : memref<2x1x256xf32, #tpu.memory_space<vmem>>, vector<1x1x256xf32>,
    }
    %c2_i32_3 = arith.constant 2 : i32
    return
  }
  func.func @transform_0(%arg0: i32, %arg1: i32) -> (i32, i32) {
    %c0_i32 = arith.constant 0 : i32
    %c0_i32_0 = arith.constant 0 : i32
    %c0_i32_1 = arith.constant 0 : i32
    return %c0_i32, %c0_i32_0 : i32, i32
  }
  func.func @transform_1(%arg0: i32, %arg1: i32) -> (i32, i32) {
    %c0_i32 = arith.constant 0 : i32
    %c0_i32_0 = arith.constant 0 : i32
    %c0_i32_1 = arith.constant 0 : i32
    return %c0_i32, %c0_i32_0 : i32, i32
  }
  func.func @transform_2(%arg0: i32, %arg1: i32) -> (i32, i32, i32) {
    %c0_i32 = arith.constant 0 : i32
    %c0_i32_0 = arith.constant 0 : i32
    return %arg0, %c0_i32, %arg1 : i32, i32, i32
  }
  func.func @transform_3(%arg0: i32, %arg1: i32) -> (i32, i32, i32) {
    %c0_i32 = arith.constant 0 : i32
    %c0_i32_0 = arith.constant 0 : i32
    return %arg0, %c0_i32, %arg1 : i32, i32, i32
  }
  func.func @transform_4(%arg0: i32, %arg1: i32) -> (i32, i32, i32) {
    %c0_i32 = arith.constant 0 : i32
    %c0_i32_0 = arith.constant 0 : i32
    return %arg0, %c0_i32, %arg1 : i32, i32, i32
  }
  func.func @transform_5(%arg0: i32, %arg1: i32) -> (i32, i32, i32) {
    %c0_i32 = arith.constant 0 : i32
    %c0_i32_0 = arith.constant 0 : i32
    return %arg0, %c0_i32, %arg1 : i32, i32, i32
  }
}

</mosaic_0001>

<bundles_post_ra>
// kernel: tpu_custom_call.1
= control target key start
LH: loop header
LB: loop body
LE: loop exit
PB: predicated region body
PF: predicated region fallthrough
CT: control target
= control target key end

     0   :  { %11 = vsyncpa [#allocation3], 0  ;;  %s2653_s0 = inlined_call_operand.vmem [shape: f32[64,32], index: 0, kind: input, shape index: {}]   ;;  %s2654_s1 = inlined_call_operand.vmem [shape: f32[64,1], index: 1, kind: input, shape index: {}]   ;;  %s2655_s2 = inlined_call_operand.vmem [shape: f32[2,32,256], index: 2, kind: input, shape index: {}]   ;;  %s2656_s3 = inlined_call_operand.hbm [shape: f32[2,32,256], index: 3, kind: output, shape index: {0}]   ;;  %s2657_s4 = inlined_call_operand.hbm [shape: s32[2,1,256], index: 4, kind: output, shape index: {1}]   ;;  %s2658_s5 = inlined_call_operand.hbm [shape: f32[2,1,256], index: 5, kind: output, shape index: {2}]  }
   0x1   :  { %12 = vsyncpa [#allocation5], 0  ;;  %v1767_v0 = vld [vmem:[%s2653_s0] sm:$0xff]  ;;  %v1772_v1 = vld [vmem:[%s2653_s0 + $0x8] sm:$0xff]  ;;  %s1844_s24 = smov 0  }
   0x2   :  { %2684 = vst [vmem:[#allocation9_spill] sm:$0xff] %v1767_v0  ;;  %2685 = vst [vmem:[#allocation10_spill] sm:$0xff] %v1772_v1  ;;  %v1777_v2 = vld [vmem:[%s2653_s0 + $0x10] sm:$0xff]  ;;  %v1782_v3 = vld [vmem:[%s2653_s0 + $0x18] sm:$0xff] }
   0x3   :  { %2686 = vst [vmem:[#allocation11_spill] sm:$0xff] %v1777_v2  ;;  %2687 = vst [vmem:[#allocation12_spill] sm:$0xff] %v1782_v3  ;;  %v1787_v4 = vld [vmem:[%s2653_s0 + $0x20] sm:$0xff]  ;;  %v1792_v5 = vld [vmem:[%s2653_s0 + $0x28] sm:$0xff] }
   0x4   :  { %2688 = vst [vmem:[#allocation13_spill] sm:$0xff] %v1787_v4  ;;  %2689 = vst [vmem:[#allocation14_spill] sm:$0xff] %v1792_v5  ;;  %v1797_v6 = vld [vmem:[%s2653_s0 + $0x30] sm:$0xff]  ;;  %v1802_v7 = vld [vmem:[%s2653_s0 + $0x38] sm:$0xff] }
   0x5   :  { %2690 = vst [vmem:[#allocation15_spill] sm:$0xff] %v1797_v6  ;;  %2691 = vst [vmem:[#allocation16_spill] sm:$0xff] %v1802_v7  ;;  %v1807_v8 = vld [vmem:[%s2654_s1] sm:$0xff]  ;;  %v1812_v9 = vld [vmem:[%s2654_s1 + $0x8] sm:$0xff] }
   0x6   :  { %2692 = vst [vmem:[#allocation17_spill] sm:$0xff] %v1807_v8  ;;  %2693 = vst [vmem:[#allocation18_spill] sm:$0xff] %v1812_v9  ;;  %v1817_v10 = vld [vmem:[%s2654_s1 + $0x10] sm:$0xff]  ;;  %v1822_v11 = vld [vmem:[%s2654_s1 + $0x18] sm:$0xff] }
   0x7   :  { %2694 = vst [vmem:[#allocation19_spill] sm:$0xff] %v1817_v10  ;;  %2695 = vst [vmem:[#allocation20_spill] sm:$0xff] %v1822_v11  ;;  %v1827_v12 = vld [vmem:[%s2654_s1 + $0x20] sm:$0xff]  ;;  %v1832_v13 = vld [vmem:[%s2654_s1 + $0x28] sm:$0xff] }
   0x8   :  { %2696 = vst [vmem:[#allocation21_spill] sm:$0xff] %v1827_v12  ;;  %2697 = vst [vmem:[#allocation22_spill] sm:$0xff] %v1832_v13  ;;  %v1837_v14 = vld [vmem:[%s2654_s1 + $0x30] sm:$0xff]  ;;  %v1842_v15 = vld [vmem:[%s2654_s1 + $0x38] sm:$0xff] }
   0x9   :  { %2698 = vst [vmem:[#allocation23_spill] sm:$0xff] %v1837_v14  ;;  %2699 = vst [vmem:[#allocation24_spill] sm:$0xff] %v1842_v15 }
   0xa LB: > { %v2704_v3 = vld [vmem:[#allocation12_spill] sm:$0xff]  ;;  %v2705_v2 = vld [vmem:[#allocation11_spill] sm:$0xff]  ;;  %v2706_v1 = vld [vmem:[#allocation10_spill] sm:$0xff]  ;;  %v2669_v16 = vmov 0.0   ;;  %v1724_v17 = vmov 0   ;;  %s1468_s25 = sshll.u32 %s1721_s24, 6  ;;  %s1721_s24 = sphi %s1844_s24, %s40_s24  }
   0xb   : > { %v2702_v5 = vld [vmem:[#allocation14_spill] sm:$0xff]  ;;  %v2703_v4 = vld [vmem:[#allocation13_spill] sm:$0xff]  ;;  %141 = vmatprep.mubr.f32.mxu0 %v2669_v16  ;;  %1641 = vset.pattern.permute.xlu0 %v1724_v17  ;;  %s1857_s27 = scalar_lea.vmem %s2655_s2, %s1468_s25  ;;  %vm52_vm0 = vcmask 261120   ;;  %vm461_vm1 = vcmask 523264   ;;  %s1402_s28 = sshll.u32 %s1721_s24, 1 }
   0xc   : > { %v2700_v7 = vld [vmem:[#allocation16_spill] sm:$0xff]  ;;  %v2701_v6 = vld [vmem:[#allocation15_spill] sm:$0xff]  ;;  %v2707_v0 = vld [vmem:[#allocation9_spill] sm:$0xff]  ;;  %1642 = vset.pattern.permute.xlu1 %v1724_v17  ;;  %868 = vmatprep.mubr.f32.mxu1 %v2669_v16  ;;  %s375_s29 = scalar_lea.vmem [#allocation4], %s1402_s28  ;;  %s2584_s30 = scalar_lea.vmem [#allocation2], %s1468_s25 }
   0xd   : > { %v2708_v8 = vld [vmem:[#allocation17_spill] sm:$0xff]  ;;  %v1865_v19 = vld [vmem:[%s1857_s27 + $0x18] sm:$0xff]  ;;  %v1868_v20 = vld [vmem:[%s1857_s27] sm:$0xff]  ;;  %s1330_s6 = scalar_lea.vmem [#allocation6], %s1402_s28  ;;  %s40_s24 = sadd.s32 1, %s1721_s24  }
   0xe   : > { %192 = vperm.xlu0 %1641, %v2708_v8   ;;  %v2709_v10 = vld [vmem:[#allocation19_spill] sm:$0xff]  ;;  %v1862_v18 = vld [vmem:[%s1857_s27 + $0x8] sm:$0xff]  ;;  %2710 = vst [vmem:[#allocation25_spill] sm:$0xff] %v1865_v19  ;;  %v1873_v22 = vld [vmem:[%s1857_s27 + $0x10] sm:$0xff]  ;;  %p37_p0 = scmp.ge.s32.totalorder %s40_s24, 2  }
   0xf   : > { %202 = vperm.xlu1 %1642, %v2709_v10   ;;  %v1470_v21 = vpack.c.bf16 %v1865_v19, %v1862_v18  ;;  %v1876_v23 = vld [vmem:[%s1857_s27 + $0x28] sm:$0xff]  ;;  %v51_v24 = vld [vmem:[%s1857_s27 + $0x38] sm:$0xff]  ;;  %v1472_v25 = vpack.c.bf16 %v1873_v22, %v1868_v20  ;;  %v1883_v27 = vld [vmem:[%s1857_s27 + $0x20] sm:$0xff]  ;;  %s1727_s7 = smov (%p37_p0), [#allocation4]  }
  0x10   : > { %2711 = vst [vmem:[#allocation26_spill] sm:$0xff] %v1876_v23  ;;  %v1474_v26 = vpack.c.bf16 %v51_v24, %v1876_v23  ;;  %2712 = vst [vmem:[#allocation27_spill] sm:$0xff] %v1883_v27  ;;  %v50_v28 = vld [vmem:[%s1857_s27 + $0x30] sm:$0xff]  ;;  %v2714_v11 = vld [vmem:[#allocation20_spill] sm:$0xff]  ;;  %s1349_s8 = sshll.u32 (%p37_p0), %s1727_s7, 4  ;;  %s1350_s8 = int_to_ptr.vmem [resolvable:$true] %s1349_s8 }
  0x11   : > { %v2713_v9 = vld [vmem:[#allocation18_spill] sm:$0xff]  ;;  %1471 = vmatprep.subr.bf16.mxu0 %v1470_v21  ;;  %v1476_v29 = vpack.c.bf16 %v50_v28, %v1883_v27  ;;  %v2715_v12 = vld [vmem:[#allocation21_spill] sm:$0xff]  ;;  %v2717_v14 = vld [vmem:[#allocation23_spill] sm:$0xff]  ;;  %s1645_s9 = scalar_lea.vmem (%p37_p0), %s1350_s8, 64  ;;  %p1650_p2 = scmp.lt.s32.totalorder (%p37_p0), %s1350_s8, %s1350_s8 }
  0x12   : > { %197 = vperm.xlu0 %1641, %v2713_v9   ;;  %1473 = vmatpush1.bf16.msra.mxu0 %v1472_v25  ;;  %v2716_v13 = vld [vmem:[#allocation22_spill] sm:$0xff]  ;;  %v2718_v15 = vld [vmem:[#allocation24_spill] sm:$0xff]  ;;  %p1646_p1 = scmp.ne.s32.totalorder (%p37_p0), %s1350_s8, %s1645_s9  ;;  %p1651_p3 = scmp.lt.s32.totalorder (%p37_p0), %s1645_s9, %s1645_s9 }
  0x13   : > { %207 = vperm.xlu1 %1642, %v2714_v11   ;;  %1475 = vmatprep.subr.bf16.mxu0 %v1474_v26 }
  0x14   :  { %p1652_p4 = por (%p37_p0), %p1651_p3, %p1650_p2 }
  0x16   : > { %212 = vperm.xlu0 %1641, %v2715_v12   ;;  %1477 = vmatpush1.bf16.msra.mxu0 %v1476_v29  ;;  %p1653_p5 = pnand (%p37_p0), %p1652_p4, %p1646_p1 }
  0x17   : > { %217 = vperm.xlu1 %1642, %v2716_v13  }
  0x19   : > { %1394 = vmatmul.mubr.msk.f32.vlgmr.msra.gmra.mrb[0].mxu0 %vm52_vm0, %v2707_v0 }
  0x1a   : > { %222 = vperm.xlu0 %1641, %v2717_v14   ;;  %147 = vmatprep.mubr.f32.mxu0 %v2669_v16 }
  0x1b   : > { %227 = vperm.xlu1 %1642, %v2718_v15  }
  0x1d   : > { %1395 = vmatmul.mubr.msk.f32.gmra.mrb[2].mxu0 %vm52_vm0, %v2706_v1 }
  0x1e   : > { %153 = vmatprep.mubr.f32.mxu0 %v2669_v16 }
  0x21   : > { %1396 = vmatmul.mubr.msk.f32.gmra.mrb[4].mxu0 %vm52_vm0, %v2705_v2 }
  0x22   : > { %159 = vmatprep.mubr.f32.mxu0 %v2669_v16 }
  0x25   : > { %1397 = vmatmul.mubr.msk.f32.gmra.mrb[6].mxu0 %vm52_vm0, %v2704_v3 }
  0x26   : > { %165 = vmatprep.mubr.f32.mxu0 %v2669_v16 }
  0x29   : > { %1398 = vmatmul.mubr.msk.f32.gmra.mrb[8].mxu0 %vm52_vm0, %v2703_v4 }
  0x2a   : > { %171 = vmatprep.mubr.f32.mxu0 %v2669_v16 }
  0x2d   : > { %1399 = vmatmul.mubr.msk.f32.gmra.mrb[10].mxu0 %vm52_vm0, %v2702_v5 }
  0x2e   : > { %177 = vmatprep.mubr.f32.mxu0 %v2669_v16 }
  0x31   : > { %1400 = vmatmul.mubr.msk.f32.gmra.mrb[12].mxu0 %vm52_vm0, %v2701_v6 }
  0x32   : > { %183 = vmatprep.mubr.f32.mxu0 %v2669_v16 }
  0x35   : > { %1401 = vmatmul.mubr.msk.f32.gmra.mrb[14].mxu0 %vm52_vm0, %v2700_v7 }
  0x36   : > { %554 = vmatprep.mubr.f32.mxu0 %v2669_v16 }
  0x38   : > { %429 = vxpose.xlu0.b32.start [1/8] (short) (narrow) %v2707_v0, 32 }
  0x3c   : > { %430 = vxpose.xlu0.b32.cont [2/8] (short) (narrow) %v2706_v1, 32 }
  0x40   : > { %431 = vxpose.xlu0.b32.cont [3/8] (short) (narrow) %v2705_v2, 32 }
  0x44   : > { %432 = vxpose.xlu0.b32.cont [4/8] (short) (narrow) %v2704_v3, 32 }
  0x48   : > { %433 = vxpose.xlu0.b32.cont [5/8] (short) (narrow) %v2703_v4, 32 }
  0x4c   : > { %434 = vxpose.xlu0.b32.cont [6/8] (short) (narrow) %v2702_v5, 32 }
  0x50   : > { %435 = vxpose.xlu0.b32.cont [7/8] (short) (narrow) %v2701_v6, 32 }
  0x54   : > { %436 = vxpose.xlu0.b32.end [8/8] (short) (narrow) %v2700_v7, 32 }
  0x8d   : > { %v193_v32 = vpop.permute.xlu0 %192 }
  0x8e   : > { %v203_v35 = vpop.permute.xlu1 %202 }
  0x91   : > { %v198_v41 = vpop.permute.xlu0 %197 }
  0x92   : > { %v208_v44 = vpop.permute.xlu1 %207 }
  0x95   : > { %v213_v53 = vpop.permute.xlu0 %212 }
  0x96   : > { %v218_v60 = vpop.permute.xlu1 %217 }
  0x99   : > { %v223_v25 = vpop.permute.xlu0 %222 }
  0xec   : > { %v143_v30 = vpop.f32.mrb[0].mxu0 }
  0xed   : > { %v145_v31 = vpop.f32.mrb[1].mxu0  ;;  %v1925_v37 = vsub.f32 %v193_v32, %v143_v30 }
  0xee   : > { %v1929_v40 = vsub.f32 %v193_v32, %v145_v31 }
  0xf0   : > { %v149_v33 = vpop.f32.mrb[2].mxu0 }
  0xf1   : > { %v151_v34 = vpop.f32.mrb[3].mxu0  ;;  %v1937_v47 = vsub.f32 %v198_v41, %v149_v33  ;;  %v228_v33 = vpop.permute.xlu1 %227 }
  0xf2   : > { %v1941_v50 = vsub.f32 %v198_v41, %v151_v34 }
  0xf4   : > { %v155_v36 = vpop.f32.mrb[4].mxu0 }
  0xf5   : > { %v1927_v38 = vsub.f32 %v203_v35, %v155_v36  ;;  %v157_v39 = vpop.f32.mrb[5].mxu0 }
  0xf6   : > { %v1931_v42 = vsub.f32 %v203_v35, %v157_v39 }
  0xf7   : > { %v255_v43 = vmin.f32 %v1925_v37, %v1927_v38 }
  0xf8   : > { %v268_v45 = vmin.f32 %v1929_v40, %v1931_v42  ;;  %v161_v46 = vpop.f32.mrb[6].mxu0 }
  0xf9   : > { %v1939_v48 = vsub.f32 %v208_v44, %v161_v46  ;;  %v163_v49 = vpop.f32.mrb[7].mxu0 }
  0xfa   : > { %v1943_v51 = vsub.f32 %v208_v44, %v163_v49  ;;  %v445_v44 = vpop.trf.xlu0 }
  0xfb   : > { %v256_v52 = vmin.f32 %v1937_v47, %v1939_v48 }
  0xfc   : > { %v269_v54 = vmin.f32 %v1941_v50, %v1943_v51  ;;  %v167_v55 = vpop.f32.mrb[8].mxu0 }
  0xfd   : > { %v1949_v56 = vsub.f32 %v213_v53, %v167_v55  ;;  %v169_v57 = vpop.f32.mrb[9].mxu0 }
  0xfe   : > { %v1951_v58 = vsub.f32 %v213_v53, %v169_v57 }
  0xff   : > { %v257_v59 = vmin.f32 %v255_v43, %v1949_v56 }
 0x100   : > { %v270_v61 = vmin.f32 %v268_v45, %v1951_v58  ;;  %v173_v62 = vpop.f32.mrb[10].mxu0 }
 0x101   : > { %v1955_v63 = vsub.f32 %v218_v60, %v173_v62  ;;  %v175_v17 = vpop.f32.mrb[11].mxu0 }
 0x102   : > { %v1957_v21 = vsub.f32 %v218_v60, %v175_v17 }
 0x103   : > { %v258_v24 = vmin.f32 %v256_v52, %v1955_v63  ;;  %v2662_v52 = vlaneseq }
 0x104   : > { %v271_v26 = vmin.f32 %v269_v54, %v1957_v21  ;;  %v179_v28 = vpop.f32.mrb[12].mxu0  ;;  %v463_v54 = vsel %vm461_vm1, %v445_v44, 0 }
 0x105   : > { %v242_v29 = vsub.f32 %v223_v25, %v179_v28  ;;  %v181_v30 = vpop.f32.mrb[13].mxu0  ;;  %v1971_v62 = vshrl.u32 %v2662_v52, 7  ;;  %v2664_v52 = vmov 1.0|1.0  }
 0x106   : > { %v1961_v31 = vsub.f32 %v223_v25, %v181_v30 }
 0x107   : > { %v259_v32 = vmin.f32 %v257_v59, %v242_v29  ;;  %v446_v59 = vpop.trf.xlu0  ;;  %v1977_v30 = vadd.s32 8, %v1971_v62 }
 0x108   : > { %v272_v34 = vmin.f32 %v270_v61, %v1961_v31  ;;  %v185_v35 = vpop.f32.mrb[14].mxu0  ;;  %v1968_v61 = vand.u32 4294901760, %v463_v54 }
 0x109   : > { %v244_v36 = vsub.f32 %v228_v33, %v185_v35  ;;  %v187_v39 = vpop.f32.mrb[15].mxu0  ;;  %v1981_v35 = vadd.s32 16, %v1971_v62 }
 0x10a   : > { %v1964_v41 = vsub.f32 %v228_v33, %v187_v39  ;;  %v1974_v28 = vsub.f32 %v463_v54, %v1968_v61  ;;  %v466_v33 = vsel %vm461_vm1, %v446_v59, 0  ;;  %v1984_v39 = vadd.s32 24, %v1971_v62 }
 0x10b   : > { %v260_v43 = vmin.f32 %v258_v24, %v244_v36 }
 0x10c   : > { %v273_v45 = vmin.f32 %v271_v26, %v1964_v41 }
 0x10d   : > { %v261_v46 = vmin.f32 %v259_v32, %v260_v43  ;;  %v1987_v43 = vadd.s32 32, %v1971_v62 }
 0x10e   : > { %v274_v49 = vmin.f32 %v272_v34, %v273_v45  ;;  %v447_v34 = vpop.trf.xlu0  ;;  %v1990_v45 = vadd.s32 40, %v1971_v62 }
 0x10f   : > { %v262_v53 = vrot.slane %v261_v46, 4  ;;  %v2004_v59 = vsel %vm461_vm1, %v447_v34, 0 }
 0x110   : > { %v275_v55 = vrot.slane %v274_v49, 4 }
 0x111   : > { %v263_v57 = vmin.f32 %v261_v46, %v262_v53  ;;  %v1993_v46 = vadd.s32 48, %v1971_v62 }
 0x112   : > { %v276_v60 = vmin.f32 %v274_v49, %v275_v55  ;;  %v1996_v49 = vadd.s32 56, %v1971_v62  ;;  %v2661_v55 = vand.u32 4294901760, %v1974_v28 }
 0x113   : > { %v264_v17 = vrot.slane %v263_v57, 2 }
 0x114   : > { %v277_v24 = vrot.slane %v276_v60, 2 }
 0x115   : > { %v265_v25 = vmin.f32 %v263_v57, %v264_v17  ;;  %v2001_v57 = vand.u32 4294901760, %v466_v33 }
 0x116   : > { %v278_v26 = vmin.f32 %v276_v60, %v277_v24 }
 0x117   : > { %v266_v32 = vrot.slane %v265_v25, 1 }
 0x118   : > { %v279_v44 = vrot.slane %v278_v26, 1 }
 0x119   : > { %v267_v53 = vmin.f32 %v265_v25, %v266_v32 }
 0x11a   : > { %v1998_v54 = vmin.f32 %v278_v26, %v279_v44  ;;  %v448_v26 = vpop.trf.xlu0 }
 0x11b   : > { %vm281_vm2 = vcmp.eq.f32.partialorder %v1925_v37, %v267_v53  ;;  %vm283_vm3 = vcmp.eq.f32.partialorder %v1937_v47, %v267_v53  ;;  %vm285_vm4 = vcmp.eq.f32.partialorder %v1927_v38, %v267_v53  ;;  %vm287_vm5 = vcmp.eq.f32.partialorder %v1939_v48, %v267_v53 }
 0x11c   : > { %vm289_vm6 = vcmp.eq.f32.partialorder %v1949_v56, %v267_v53  ;;  %vm291_vm7 = vcmp.eq.f32.partialorder %v1955_v63, %v267_v53  ;;  %vm293_vm8 = vcmp.eq.f32.partialorder %v242_v29, %v267_v53  ;;  %vm295_vm9 = vcmp.eq.f32.partialorder %v244_v36, %v267_v53 }
 0x11d   : > { %v297_v60 = vsel %vm281_vm2, %v1971_v62, 64  ;;  %v299_v17 = vsel %vm283_vm3, %v1977_v30, 64  ;;  %v301_v24 = vsel %vm285_vm4, %v1981_v35, 64  ;;  %v303_v37 = vsel %vm287_vm5, %v1984_v39, 64 }
 0x11e   : > { %v305_v47 = vsel %vm289_vm6, %v1987_v43, 64  ;;  %v307_v38 = vsel %vm291_vm7, %v1990_v45, 64  ;;  %v309_v48 = vsel %vm293_vm8, %v1993_v46, 64  ;;  %v311_v56 = vsel %vm295_vm9, %v1996_v49, 64 }
 0x11f   : > { %vm313_vm10 = vcmp.lt.s32.totalorder %v297_v60, %v301_v24  ;;  %vm315_vm11 = vcmp.lt.s32.totalorder %v299_v17, %v303_v37  ;;  %vm282_vm12 = vcmp.eq.f32.partialorder %v1929_v40, %v1998_v54  ;;  %vm284_vm13 = vcmp.eq.f32.partialorder %v1941_v50, %v1998_v54 }
 0x120   : > { %v314_v63 = vsel %vm313_vm10, %v297_v60, %v301_v24  ;;  %v316_v29 = vsel %vm315_vm11, %v299_v17, %v303_v37  ;;  %vm286_vm14 = vcmp.eq.f32.partialorder %v1931_v42, %v1998_v54  ;;  %vm288_vm15 = vcmp.eq.f32.partialorder %v1943_v51, %v1998_v54 }
 0x121   : > { %vm317_vm0 = vcmp.lt.s32.totalorder %v314_v63, %v305_v47  ;;  %vm319_vm2 = vcmp.lt.s32.totalorder %v316_v29, %v307_v38  ;;  %vm290_vm3 = vcmp.eq.f32.partialorder %v1951_v58, %v1998_v54  ;;  %vm292_vm4 = vcmp.eq.f32.partialorder %v1957_v21, %v1998_v54 }
 0x122   : > { %v318_v36 = vsel %vm317_vm0, %v314_v63, %v305_v47  ;;  %v320_v25 = vsel %vm319_vm2, %v316_v29, %v307_v38  ;;  %vm294_vm5 = vcmp.eq.f32.partialorder %v1961_v31, %v1998_v54  ;;  %vm296_vm6 = vcmp.eq.f32.partialorder %v1964_v41, %v1998_v54 }
 0x123   : > { %vm321_vm7 = vcmp.lt.s32.totalorder %v318_v36, %v309_v48  ;;  %vm323_vm8 = vcmp.lt.s32.totalorder %v320_v25, %v311_v56  ;;  %v298_v32 = vsel %vm282_vm12, %v1971_v62, 64  ;;  %v300_v34 = vsel %vm284_vm13, %v1977_v30, 64 }
 0x124   : > { %v322_v44 = vsel %vm321_vm7, %v318_v36, %v309_v48  ;;  %v324_v53 = vsel %vm323_vm8, %v320_v25, %v311_v56  ;;  %v302_v60 = vsel %vm286_vm14, %v1981_v35, 64  ;;  %v304_v17 = vsel %vm288_vm15, %v1984_v39, 64 }
 0x125   : > { %vm325_vm9 = vcmp.lt.s32.totalorder %v322_v44, %v324_v53  ;;  %v2053_v40 = vsub.f32 %v466_v33, %v2001_v57  ;;  %v2056_v24 = vand.u32 4294901760, %v2004_v59  ;;  %v472_v50 = vsel %vm461_vm1, %v448_v26, 0 }
 0x126   : > { %v326_v37 = vsel %vm325_vm9, %v322_v44, %v324_v53  ;;  %v306_v42 = vsel %vm290_vm3, %v1987_v43, 64  ;;  %vm336_vm10 = vcmp.lt.s32.totalorder %v298_v32, %v302_v60  ;;  %vm338_vm11 = vcmp.lt.s32.totalorder %v300_v34, %v304_v17 }
 0x127   : > { %v327_v47 = vrot.slane %v326_v37, 4  ;;  %v308_v51 = vsel %vm292_vm4, %v1990_v45, 64  ;;  %v337_v33 = vsel %vm336_vm10, %v298_v32, %v302_v60  ;;  %v339_v38 = vsel %vm338_vm11, %v300_v34, %v304_v17 }
 0x128   : > { %v310_v48 = vsel %vm294_vm5, %v1993_v46, 64  ;;  %vm340_vm1 = vcmp.lt.s32.totalorder %v337_v33, %v306_v42  ;;  %vm342_vm12 = vcmp.lt.s32.totalorder %v339_v38, %v308_v51  ;;  %v2071_v56 = vand.u32 4294901760, %v472_v50 }
 0x129   : > { %vm328_vm13 = vcmp.lt.s32.totalorder %v326_v37, %v327_v47  ;;  %v312_v58 = vsel %vm296_vm6, %v1996_v49, 64  ;;  %v341_v63 = vsel %vm340_vm1, %v337_v33, %v306_v42  ;;  %v343_v21 = vsel %vm342_vm12, %v339_v38, %v308_v51 }
 0x12a   : > { %v329_v29 = vsel %vm328_vm13, %v326_v37, %v327_v47  ;;  %vm344_vm14 = vcmp.lt.s32.totalorder %v341_v63, %v310_v48  ;;  %vm346_vm15 = vcmp.lt.s32.totalorder %v343_v21, %v312_v58  ;;  %v2660_v36 = vand.u32 4294901760, %v2053_v40 }
 0x12b   : > { %v330_v25 = vrot.slane %v329_v29, 2  ;;  %v345_v31 = vsel %vm344_vm14, %v341_v63, %v310_v48  ;;  %v347_v26 = vsel %vm346_vm15, %v343_v21, %v312_v58  ;;  %v2081_v32 = vsub.f32 %v1974_v28, %v2661_v55 }
 0x12c   : > { %vm348_vm0 = vcmp.lt.s32.totalorder %v345_v31, %v347_v26  ;;  %v2085_v41 = vsub.f32 %v2004_v59, %v2056_v24  ;;  %v2088_v54 = vsub.f32 %v472_v50, %v2071_v56  ;;  %v2093_v60 = vsub.f32 %v2053_v40, %v2660_v36 }
 0x12d   : > { %vm331_vm2 = vcmp.lt.s32.totalorder %v329_v29, %v330_v25  ;;  %v349_v34 = vsel %vm348_vm0, %v345_v31, %v347_v26  ;;  %v1725_v17 = vmov 1966171168  }
 0x12e   : > { %v332_v44 = vsel %vm331_vm2, %v329_v29, %v330_v25  ;;  %v350_v53 = vrot.slane %v349_v34, 4  ;;  %v2095_v37 = vunpack.c.l.s4 %v1725_v17  ;;  %v2659_v51 = vand.u32 4294901760, %v2085_v41 }
 0x12f   : > { %v333_v42 = vrot.slane %v332_v44, 1 }
 0x130   : > { %vm351_vm3 = vcmp.lt.s32.totalorder %v349_v34, %v350_v53 }
 0x131   : > { %vm334_vm4 = vcmp.lt.s32.totalorder %v332_v44, %v333_v42  ;;  %v352_v59 = vsel %vm351_vm3, %v349_v34, %v350_v53  ;;  %v2133_v34 = vsub.f32 %v2085_v41, %v2659_v51 }
 0x132   : > { %v2100_v33 = vsel %vm334_vm4, %v332_v44, %v333_v42  ;;  %v353_v38 = vrot.slane %v352_v59, 2 }
 0x133   : > { %vm381_vm5 = vcmp.eq.s32.totalorder %v1971_v62, %v2100_v33  ;;  %vm383_vm6 = vcmp.eq.s32.totalorder %v1977_v30, %v2100_v33  ;;  %vm385_vm7 = vcmp.eq.s32.totalorder %v1981_v35, %v2100_v33  ;;  %vm387_vm8 = vcmp.eq.s32.totalorder %v1984_v39, %v2100_v33 }
 0x134   : > { %vm354_vm9 = vcmp.lt.s32.totalorder %v352_v59, %v353_v38  ;;  %v1407_v63 = vsel %vm385_vm7, 1.0, %v2669_v16  ;;  %v1409_v21 = vsel %vm387_vm8, 1.0, %v2669_v16  ;;  %v1403_v29 = vsel %vm381_vm5, 1.0, %v2669_v16  ;;  %vm2193_vm4 = vmpackc.low %vm383_vm6, %vm381_vm5 }
 0x135   : > { %v355_v25 = vsel %vm354_vm9, %v352_v59, %v353_v38  ;;  %v2124_v31 = vsub.f32 %v1407_v63, %v1407_v63  ;;  %v1405_v26 = vsel %vm383_vm6, 1.0, %v2669_v16  ;;  %v2135_v53 = vsub.f32 %v1403_v29, %v1403_v29 }
 0x136   : > { %v356_v44 = vrot.slane %v355_v25, 1  ;;  %v2137_v17 = vsub.f32 %v1405_v26, %v1405_v26  ;;  %vm389_vm10 = vcmp.eq.s32.totalorder %v1987_v43, %v2100_v33  ;;  %v2141_v42 = vsub.f32 %v1409_v21, %v1409_v21 }
 0x137   : > { %vm391_vm11 = vcmp.eq.s32.totalorder %v1990_v45, %v2100_v33  ;;  %v1411_v59 = vsel %vm389_vm10, 1.0, %v2669_v16  ;;  %vm393_vm1 = vcmp.eq.s32.totalorder %v1993_v46, %v2100_v33  ;;  %vm395_vm13 = vcmp.eq.s32.totalorder %v1996_v49, %v2100_v33 }
 0x138   : > { %vm357_vm12 = vcmp.lt.s32.totalorder %v355_v25, %v356_v44  ;;  %v1512_v21 = vpack.c.bf16 %v2137_v17, %v2135_v53  ;;  %v1413_v26 = vsel %vm391_vm11, 1.0, %v2669_v16  ;;  %v2161_v51 = vsub.f32 %v1411_v59, %v1411_v59 }
 0x139   : > { %v2155_v29 = vsel %vm357_vm12, %v355_v25, %v356_v44  ;;  %v1516_v2 = vpack.c.bf16 %v2141_v42, %v2124_v31  ;;  %v2730_v7 = vand.u32 4294901760, %v2135_v53  ;;  %v2731_v10 = vand.u32 4294901760, %v2137_v17 }
 0x13a   : > { %vm382_vm14 = vcmp.eq.s32.totalorder %v1971_v62, %v2155_v29  ;;  %vm384_vm15 = vcmp.eq.s32.totalorder %v1977_v30, %v2155_v29  ;;  %vm386_vm0 = vcmp.eq.s32.totalorder %v1981_v35, %v2155_v29  ;;  %vm388_vm2 = vcmp.eq.s32.totalorder %v1984_v39, %v2155_v29 }
 0x13b   : > { %vm2173_vm3 = vmpackc.low %vm384_vm15, %vm382_vm14  ;;  %v1408_v44 = vsel %vm386_vm0, 1.0, %v2669_v16  ;;  %v1410_v59 = vsel %vm388_vm2, 1.0, %v2669_v16  ;;  %v1404_v36 = vsel %vm382_vm14, 1.0, %v2669_v16  ;;  %v1406_v55 = vsel %vm384_vm15, 1.0, %v2669_v16 }
 0x13c   : > { %1479 = vmatprep.subr.msk.bf16.mxu0 %vm2173_vm3, %v2664_v52  ;;  %v2197_v48 = vsub.f32 %v1408_v44, %v1408_v44  ;;  %v2199_v58 = vsub.f32 %v1410_v59, %v1410_v59  ;;  %v2201_v47 = vsub.f32 %v1404_v36, %v1404_v36  ;;  %v2203_v63 = vsub.f32 %v1406_v55, %v1406_v55  ;;  %vm2211_vm9 = vmpackc.low %vm388_vm2, %vm386_vm0 }
 0x13d   : > { %1481 = vmatpush1.bf16.msk.msra.mxu0 %vm2193_vm4, %v2664_v52  ;;  %vm390_vm5 = vcmp.eq.s32.totalorder %v1987_v43, %v2155_v29  ;;  %vm392_vm6 = vcmp.eq.s32.totalorder %v1990_v45, %v2155_v29  ;;  %v2219_v36 = vsub.f32 %v1413_v26, %v1413_v26  ;;  %vm394_vm12 = vcmp.eq.s32.totalorder %v1993_v46, %v2155_v29  ;;  %vm2254_vm15 = vmpackc.low %vm387_vm8, %vm385_vm7 }
 0x13e   : > { %1483 = vmatprep.subr.msk.bf16.mxu0 %vm2211_vm9, %v2664_v52  ;;  %v1510_v55 = vpack.c.bf16 %v2203_v63, %v2201_v47  ;;  %v1412_v44 = vsel %vm390_vm5, 1.0, %v2669_v16  ;;  %v1414_v26 = vsel %vm392_vm6, 1.0, %v2669_v16  ;;  %v1514_v59 = vpack.c.bf16 %v2199_v58, %v2197_v48  ;;  %vm2281_vm7 = vmpackc.low %vm392_vm6, %vm390_vm5 }
 0x13f   : > { %v2238_v38 = vsub.f32 %v1412_v44, %v1412_v44  ;;  %v2240_v0 = vsub.f32 %v1414_v26, %v1414_v26  ;;  %vm396_vm14 = vcmp.eq.s32.totalorder %v1996_v49, %v2155_v29  ;;  %v1416_v52 = vsel %vm394_vm12, 1.0, %v2669_v16  ;;  %vm2318_vm8 = vmpackc.low %vm391_vm11, %vm389_vm10 }
 0x140   : > { %1511 = vmatprep.subr.bf16.mxu1 %v1510_v55  ;;  %v1418_v26 = vsel %vm396_vm14, 1.0, %v2669_v16  ;;  %v2262_v1 = vsub.f32 %v1416_v52, %v1416_v52  ;;  %v1415_v55 = vsel %vm393_vm1, 1.0, %v2669_v16  ;;  %v1417_v35 = vsel %vm395_vm13, 1.0, %v2669_v16  ;;  %vm2337_vm10 = vmpackc.low %vm396_vm14, %vm394_vm12 }
 0x141   : > { %v2727_v39 = vmov 1.0|1.0   ;;  %1513 = vmatpush1.bf16.msra.mxu1 %v1512_v21  ;;  %v2287_v3 = vsub.f32 %v1418_v26, %v1418_v26  ;;  %v1518_v16 = vpack.c.bf16 %v2240_v0, %v2238_v38  ;;  %v2675_v21 = vand.u32 4294901760, %v2201_v47  ;;  %vm2365_vm11 = vmpackc.low %vm395_vm13, %vm393_vm1 }
 0x142   : > { %1485 = vmatpush1.bf16.msk.msra.mxu0 %vm2254_vm15, %v2727_v39  ;;  %1515 = vmatprep.subr.bf16.mxu1 %v1514_v59  ;;  %v2295_v4 = vsub.f32 %v1415_v55, %v1415_v55  ;;  %v2297_v5 = vsub.f32 %v1417_v35, %v1417_v35  ;;  %v2676_v6 = vand.u32 4294901760, %v2203_v63  ;;  %v608_v26 = vsub.f32 %v2135_v53, %v2730_v7 }
 0x143   : > { %1487 = vmatprep.subr.msk.bf16.mxu0 %vm2281_vm7, %v2727_v39  ;;  %v1520_v8 = vpack.c.bf16 %v2219_v36, %v2161_v51  ;;  %v602_v9 = vsub.f32 %v2201_v47, %v2675_v21  ;;  %v620_v59 = vsub.f32 %v2137_v17, %v2731_v10  ;;  %v1522_v21 = vpack.c.bf16 %v2287_v3, %v2262_v1 }
 0x144   : > { %v614_v35 = vsub.f32 %v2203_v63, %v2676_v6  ;;  %v609_v10 = vand.u32 4294901760, %v608_v26  ;;  %v2736_v26 = vand.u32 4294901760, %v2197_v48  ;;  %v2678_v11 = vand.u32 4294901760, %v2124_v31 }
 0x145   : > { %1517 = vmatpush1.bf16.msra.mxu1 %v1516_v2  ;;  %v603_v45 = vand.u32 4294901760, %v602_v9  ;;  %v621_v6 = vand.u32 4294901760, %v620_v59  ;;  %v2737_v12 = vand.u32 4294901760, %v2199_v58  ;;  %v2679_v14 = vand.u32 4294901760, %v2141_v42 }
 0x146   : > { %1489 = vmatpush1.bf16.msk.msra.mxu0 %vm2318_vm8, %v2727_v39  ;;  %v626_v55 = vsub.f32 %v2197_v48, %v2736_v26  ;;  %1519 = vmatprep.subr.bf16.mxu1 %v1518_v16  ;;  %v615_v2 = vand.u32 4294901760, %v614_v35  ;;  %v2681_v9 = vand.u32 4294901760, %v2238_v38  ;;  %v1524_v59 = vpack.c.bf16 %v2297_v5, %v2295_v4 }
 0x147   : > { %1491 = vmatprep.subr.msk.bf16.mxu0 %vm2337_vm10, %v2727_v39  ;;  %v638_v13 = vsub.f32 %v2199_v58, %v2737_v12  ;;  %v632_v15 = vsub.f32 %v2124_v31, %v2678_v11  ;;  %v2683_v23 = vand.u32 4294901760, %v2240_v0  ;;  %v1496_v46 = vpack.c.bf16 %v621_v6, %v609_v10 }
 0x148   : > { %v627_v26 = vand.u32 4294901760, %v626_v55  ;;  %v1494_v16 = vpack.c.bf16 %v615_v2, %v603_v45  ;;  %v644_v55 = vsub.f32 %v2141_v42, %v2679_v14  ;;  %v650_v11 = vsub.f32 %v2238_v38, %v2681_v9 }
 0x149   : > { %v639_v35 = vand.u32 4294901760, %v638_v13  ;;  %1521 = vmatpush1.bf16.msra.mxu1 %v1520_v8  ;;  %v662_v49 = vsub.f32 %v2240_v0, %v2683_v23  ;;  %v655_v13 = vand.u32 4294901760, %v2161_v51  ;;  %v667_v45 = vand.u32 4294901760, %v2219_v36 }
 0x14a   : > { %1493 = vmatpush1.bf16.msk.msra.mxu0 %vm2365_vm11, %v2727_v39  ;;  %1523 = vmatprep.subr.bf16.mxu1 %v1522_v21  ;;  %v633_v14 = vand.u32 4294901760, %v632_v15  ;;  %v645_v27 = vand.u32 4294901760, %v644_v55  ;;  %v673_v9 = vand.u32 4294901760, %v2262_v1  ;;  %v651_v19 = vand.u32 4294901760, %v650_v11 }
 0x14b   : > { %1495 = vmatprep.subr.bf16.mxu0 %v1494_v16  ;;  %v1498_v2 = vpack.c.bf16 %v639_v35, %v627_v26  ;;  %v656_v6 = vsub.f32 %v2161_v51, %v655_v13  ;;  %v668_v8 = vsub.f32 %v2219_v36, %v667_v45  ;;  %v685_v10 = vand.u32 4294901760, %v2287_v3 }
 0x14c   : > { %v2740_v23 = vand.u32 4294901760, %v2081_v32  ;;  %v663_v21 = vand.u32 4294901760, %v662_v49  ;;  %v674_v15 = vsub.f32 %v2262_v1, %v673_v9  ;;  %v679_v11 = vand.u32 4294901760, %v2295_v4 }
 0x14d   : > { %v691_v26 = vand.u32 4294901760, %v2297_v5  ;;  %1525 = vmatpush1.bf16.msra.mxu1 %v1524_v59  ;;  %v686_v16 = vsub.f32 %v2287_v3, %v685_v10  ;;  %v581_v32 = vand.u32 4294901760, %v2133_v34  ;;  %v2741_v35 = vunpack.c.0.s8 %v2095_v37 }
 0x14e   : > { %560 = vmatmul.mubr.f32.vlgmr.msra.gmra.mrb[16].mxu0 %v2740_v23  ;;  %1527 = vmatprep.subr.msk.bf16.mxu1 %vm2173_vm3, %v2727_v39  ;;  %v1500_v23 = vpack.c.bf16 %v645_v27, %v633_v14  ;;  %v657_v59 = vand.u32 4294901760, %v656_v6  ;;  %v669_v49 = vand.u32 4294901760, %v668_v8  ;;  %v2743_v27 = vand.u32 4294901760, %v2093_v60 }
 0x14f   : > { %1497 = vmatpush1.bf16.msra.mxu0 %v1496_v46  ;;  %v2408_v55 = vsub.s32 %v2741_v35, %v1971_v62  ;;  %v2742_v46 = vmov 0.0   ;;  %v692_v14 = vsub.f32 %v2297_v5, %v691_v26  ;;  %v1502_v37 = vpack.c.bf16 %v663_v21, %v651_v19 }
 0x150   : > { %1499 = vmatprep.subr.bf16.mxu0 %v1498_v2  ;;  %565 = vmatprep.mubr.f32.mxu0 %v2742_v46  ;;  %v680_v2 = vsub.f32 %v2295_v4, %v679_v11  ;;  %v675_v62 = vand.u32 4294901760, %v674_v15  ;;  %v687_v34 = vand.u32 4294901760, %v686_v16  ;;  %v2744_v35 = vand.u32 4294901760, %v2088_v54 }
 0x151   : > { %871 = vmatmul.mubr.f32.vlgmr.msra.gmra.mrb[0].mxu1 %v1974_v28  ;;  %v359_v19 = vcombine.low %v2100_v33, %v2155_v29  ;;  %v1504_v60 = vpack.c.bf16 %v669_v49, %v657_v59  ;;  %v693_v21 = vand.u32 4294901760, %v692_v14  ;;  %v2745_v33 = vlaneseq }
 0x152   : > { %571 = vmatmul.mubr.f32.gmra.mrb[18].mxu0 %v2743_v27  ;;  %v591_v6 = vsub.f32 %v2088_v54, %v2744_v35  ;;  %1529 = vmatpush1.bf16.msk.msra.mxu1 %vm2193_vm4, %v2727_v39  ;;  %v681_v8 = vand.u32 4294901760, %v680_v2  ;;  %v1506_v15 = vpack.c.bf16 %v687_v34, %v675_v62  ;;  %v2748_v49 = vand.u32 4294901760, %v2201_v47 }
 0x153   : > { %1501 = vmatpush1.bf16.msra.mxu0 %v1500_v23  ;;  %1531 = vmatprep.subr.msk.bf16.mxu1 %vm2211_vm9, %v2727_v39  ;;  %v366_v23 = vrot.slane %v359_v19, %v2408_v55  ;;  %vm2440_vm1 = vcmp.lt.s32.totalorder %v2745_v33, 256  ;;  %v2749_v2 = vand.u32 4294901760, %v2203_v63  ;;  %v2750_v47 = vand.u32 4294901760, %v2135_v53  ;;  %v2764_v33 = vld [vmem:[#allocation26_spill] sm:$0xff] }
 0x154   : > { %1503 = vmatprep.subr.bf16.mxu0 %v1502_v37  ;;  %576 = vmatprep.mubr.f32.mxu0 %v2742_v46  ;;  %v592_v16 = vand.u32 4294901760, %v591_v6  ;;  %v1508_v59 = vpack.c.bf16 %v693_v21, %v681_v8  ;;  %v2751_v63 = vand.u32 4294901760, %v2137_v17  ;;  %v2752_v37 = vand.u32 4294901760, %v1974_v28 }
 0x155   : > { %876 = vmatprep.mubr.f32.mxu1 %v2742_v46  ;;  %v1542_v14 = vpack.c.bf16 %v2749_v2, %v2748_v49  ;;  %v2753_v62 = vand.u32 4294901760, %v2197_v48  ;;  %v2754_v34 = vand.u32 4294901760, %v2199_v58  ;;  %v2755_v28 = vand.u32 4294901760, %v2124_v31 }
 0x156   : > { %582 = vmatmul.mubr.f32.gmra.mrb[20].mxu0 %v581_v32  ;;  %879 = vmatmul.mubr.f32.gmra.mrb[2].mxu1 %v2053_v40  ;;  %v373_v32 = vrot.slane %v366_v23, %v2408_v55  ;;  %v1544_v27 = vpack.c.bf16 %v2751_v63, %v2750_v47  ;;  %v2756_v48 = vand.u32 4294901760, %v2141_v42  ;;  %v2757_v53 = vand.u32 4294901760, %v2053_v40 }
 0x157   : > { %1505 = vmatpush1.bf16.msra.mxu0 %v1504_v60  ;;  %1533 = vmatpush1.bf16.msk.msra.mxu1 %vm2254_vm15, %v2727_v39  ;;  %v1546_v35 = vpack.c.bf16 %v2754_v34, %v2753_v62  ;;  %v2758_v17 = vand.u32 4294901760, %v2238_v38  ;;  %v2759_v6 = vand.u32 4294901760, %v2240_v0  ;;  %v1552_v0 = vpack.c.bf16 %v667_v45, %v655_v13  ;;  %v2762_v45 = vld [vmem:[#allocation25_spill] sm:$0xff] }
 0x158   : > { %1507 = vmatprep.subr.bf16.mxu0 %v1506_v15  ;;  %1535 = vmatprep.subr.msk.bf16.mxu1 %vm2281_vm7, %v2727_v39  ;;  %380 = vst.msk [vmem:[%s375_s29] sm:$0x3] %vm2440_vm1, %v373_v32  ;;  %v1548_v58 = vpack.c.bf16 %v2756_v48, %v2755_v28  ;;  %v2760_v40 = vand.u32 4294901760, %v2085_v41  ;;  %v1554_v31 = vpack.c.bf16 %v685_v10, %v673_v9  ;;  %v2761_v1 = vand.u32 4294901760, %v2088_v54 }
 0x159   : > { %587 = vmatprep.mubr.f32.mxu0 %v2742_v46  ;;  %884 = vmatprep.mubr.f32.mxu1 %v2742_v46  ;;  %v1550_v19 = vpack.c.bf16 %v2759_v6, %v2758_v17 }
 0x15a   : > { %593 = vmatmul.mubr.f32.gmra.mrb[22].mxu0 %v592_v16  ;;  %887 = vmatmul.mubr.f32.gmra.mrb[4].mxu1 %v2085_v41  ;;  %v1556_v41 = vpack.c.bf16 %v691_v26, %v679_v11 }
 0x15b   : > { %1509 = vmatpush1.bf16.msra.mxu0 %v1508_v59  ;;  %1537 = vmatpush1.bf16.msk.msra.mxu1 %vm2318_vm8, %v2727_v39 }
 0x15c   : > { %1539 = vmatprep.subr.msk.bf16.mxu1 %vm2337_vm10, %v2727_v39  ;;  %1559 = vmatprep.subr.msk.bf16.mxu0 %vm2173_vm3, %v2727_v39 }
 0x15d   : > { %743 = vmatprep.mubr.f32.mxu0 %v2742_v46  ;;  %892 = vmatprep.mubr.f32.mxu1 %v2742_v46 }
 0x15e   : > { %745 = vmatmul.mubr.f32.vlgmr.msra.gmra.mrb[16].mxu0 %v1968_v61  ;;  %895 = vmatmul.mubr.f32.gmra.mrb[6].mxu1 %v2088_v54 }
 0x15f   : > { %1541 = vmatpush1.bf16.msk.msra.mxu1 %vm2365_vm11, %v2727_v39  ;;  %1561 = vmatpush1.bf16.msk.msra.mxu0 %vm2193_vm4, %v2727_v39 }
 0x160   : > { %1543 = vmatprep.subr.bf16.mxu1 %v1542_v14  ;;  %1563 = vmatprep.subr.msk.bf16.mxu0 %vm2211_vm9, %v2727_v39 }
 0x161   : > { %750 = vmatprep.mubr.f32.mxu0 %v2742_v46  ;;  %981 = vmatprep.mubr.f32.mxu1 %v2742_v46 }
 0x162   : > { %752 = vmatmul.mubr.f32.gmra.mrb[18].mxu0 %v2001_v57  ;;  %985 = vmatmul.mubr.f32.vlgmr.msra.gmra.mrb[0].mxu1 %v2752_v37  ;;  %v1643_v37 = vld [vmem:[%s1857_s27 + $0x30] sm:$0xff] }
 0x163   : > { %1545 = vmatpush1.bf16.msra.mxu1 %v1544_v27  ;;  %1565 = vmatpush1.bf16.msk.msra.mxu0 %vm2254_vm15, %v2727_v39 }
 0x164   : > { %1547 = vmatprep.subr.bf16.mxu1 %v1546_v35  ;;  %1567 = vmatprep.subr.msk.bf16.mxu0 %vm2281_vm7, %v2727_v39  ;;  %v1644_v35 = vld [vmem:[%s1857_s27 + $0x38] sm:$0xff] }
 0x165   : > { %757 = vmatprep.mubr.f32.mxu0 %v2742_v46  ;;  %990 = vmatprep.mubr.f32.mxu1 %v2742_v46 }
 0x166   : > { %759 = vmatmul.mubr.f32.gmra.mrb[20].mxu0 %v2056_v24  ;;  %994 = vmatmul.mubr.f32.gmra.mrb[2].mxu1 %v2757_v53 }
 0x167   : > { %1549 = vmatpush1.bf16.msra.mxu1 %v1548_v58  ;;  %1569 = vmatpush1.bf16.msk.msra.mxu0 %vm2318_vm8, %v2727_v39 }
 0x168   : > { %1551 = vmatprep.subr.bf16.mxu1 %v1550_v19  ;;  %1571 = vmatprep.subr.msk.bf16.mxu0 %vm2337_vm10, %v2727_v39 }
 0x169   : > { %764 = vmatprep.mubr.f32.mxu0 %v2742_v46  ;;  %999 = vmatprep.mubr.f32.mxu1 %v2742_v46 }
 0x16a   : > { %766 = vmatmul.mubr.f32.gmra.mrb[22].mxu0 %v2071_v56  ;;  %1003 = vmatmul.mubr.f32.gmra.mrb[4].mxu1 %v2760_v40 }
 0x16b   : > { %1553 = vmatpush1.bf16.msra.mxu1 %v1552_v0  ;;  %1573 = vmatpush1.bf16.msk.msra.mxu0 %vm2365_vm11, %v2727_v39 }
 0x16c   : > { %1555 = vmatprep.subr.bf16.mxu1 %v1554_v31  ;;  %1008 = vmatprep.mubr.f32.mxu1 %v2742_v46 }
 0x16d   : > { %1239 = vmatprep.mubr.f32.mxu0 %v2742_v46 }
 0x16e   : > { %1012 = vmatmul.mubr.f32.gmra.mrb[6].mxu1 %v2761_v1  ;;  %1241 = vmatmul.mubr.f32.vlgmr.msra.gmra.mrb[24].mxu0 %v1968_v61 }
 0x16f   : > { %1557 = vmatpush1.bf16.msra.mxu1 %v1556_v41  ;;  %1130 = vmatprep.mubr.f32.mxu1 %v2742_v46 }
 0x170   : > { %1574 = vmatprep.subr.msk.bf16.mxu1 %vm2173_vm3, %v2727_v39 }
 0x172   : > { %1132 = vmatmul.mubr.f32.vlgmr.msra.gmra.mrb[0].mxu1 %v1968_v61 }
 0x173   : > { %1578 = vmatpush1.bf16.msk.msra.mxu1 %vm2193_vm4, %v2727_v39  ;;  %1137 = vmatprep.mubr.f32.mxu1 %v2742_v46 }
 0x174   : > { %1575 = vmatprep.subr.msk.bf16.mxu1 %vm2211_vm9, %v2727_v39 }
 0x176   : > { %1139 = vmatmul.mubr.f32.gmra.mrb[2].mxu1 %v2001_v57 }
 0x177   : > { %1579 = vmatpush1.bf16.msk.msra.mxu1 %vm2254_vm15, %v2727_v39  ;;  %1144 = vmatprep.mubr.f32.mxu1 %v2742_v46 }
 0x178   : > { %1576 = vmatprep.subr.msk.bf16.mxu1 %vm2281_vm7, %v2727_v39 }
 0x17a   : > { %1146 = vmatmul.mubr.f32.gmra.mrb[4].mxu1 %v2056_v24 }
 0x17b   : > { %1580 = vmatpush1.bf16.msk.msra.mxu1 %vm2318_vm8, %v2727_v39  ;;  %1151 = vmatprep.mubr.f32.mxu1 %v2742_v46 }
 0x17c   : > { %1577 = vmatprep.subr.msk.bf16.mxu1 %vm2337_vm10, %v2727_v39 }
 0x17e   : > { %1153 = vmatmul.mubr.f32.gmra.mrb[6].mxu1 %v2071_v56 }
 0x17f   : > { %1581 = vmatpush1.bf16.msk.msra.mxu1 %vm2365_vm11, %v2727_v39  ;;  %1246 = vmatprep.mubr.f32.mxu1 %v2742_v46 }
 0x182   : > { %1248 = vmatmul.mubr.f32.vlgmr.msra.gmra.mrb[2].mxu1 %v2001_v57 }
 0x183   : > { %1253 = vmatprep.mubr.f32.mxu1 %v2742_v46 }
 0x186   : > { %1255 = vmatmul.mubr.f32.gmra.mrb[4].mxu1 %v2056_v24 }
 0x187   : > { %1260 = vmatprep.mubr.f32.mxu1 %v2742_v46 }
 0x18a   : > { %1262 = vmatmul.mubr.f32.gmra.mrb[6].mxu1 %v2071_v56 }
 0x231   : > { %v746_v3 = vpop.f32.mrb[16].mxu0 }
 0x232   : > { %v748_v4 = vpop.f32.mrb[17].mxu0 }
 0x235   : > { %v753_v5 = vpop.f32.mrb[18].mxu0 }
 0x236   : > { %v755_v61 = vpop.f32.mrb[19].mxu0 }
 0x239   : > { %v760_v54 = vpop.f32.mrb[20].mxu0 }
 0x23a   : > { %v762_v51 = vpop.f32.mrb[21].mxu0 }
 0x23d   : > { %v767_v50 = vpop.f32.mrb[22].mxu0 }
 0x23e   : > { %v769_v42 = vpop.f32.mrb[23].mxu0 }
 0x241   : > { %v1242_v38 = vpop.f32.mrb[24].mxu0 }
 0x242   : > { %v1244_v25 = vpop.f32.mrb[25].mxu0 }
 0x245   : > { %v1133_v57 = vpop.f32.mrb[0].mxu1 }
 0x246   : > { %v1582_v30 = vadd.f32 %v1133_v57, %v746_v3  ;;  %v1135_v36 = vpop.f32.mrb[1].mxu1 }
 0x247   : > { %v1584_v44 = vadd.f32 %v1135_v36, %v748_v4 }
 0x248   : > { %v1583_v24 = vadd.f32 %v1582_v30, %v1242_v38 }
 0x249   : > { %v1585_v39 = vadd.f32 %v1584_v44, %v1244_v25 }
 0x24a   : > { %1270 = vst [vmem:[%s2584_s30] sm:$0xff] %v1583_v24  ;;  %v1278_v52 = vsub.f32 %v1583_v24, %v1868_v20 }
 0x24b   : > { %1271 = vst [vmem:[%s2584_s30 + $0x8] sm:$0xff] %v1585_v39  ;;  %v1279_v9 = vsub.f32 %v1585_v39, %v1862_v18  ;;  %v2763_v18 = vld [vmem:[#allocation27_spill] sm:$0xff] }
 0x24c   : > { %v1286_v26 = vmul.f32 %v1278_v52, %v1278_v52 }
 0x24d   : > { %v1287_v21 = vmul.f32 %v1279_v9, %v1279_v9 }
 0x255   : > { %v1249_v56 = vpop.f32.mrb[2].mxu1 }
 0x256   : > { %v1586_v7 = vadd.f32 %v1249_v56, %v753_v5  ;;  %v1251_v43 = vpop.f32.mrb[3].mxu1 }
 0x257   : > { %v1587_v12 = vadd.f32 %v1251_v43, %v755_v61 }
 0x258   : > { %1272 = vst [vmem:[%s2584_s30 + $0x10] sm:$0xff] %v1586_v7  ;;  %v1280_v13 = vsub.f32 %v1586_v7, %v1873_v22 }
 0x259   : > { %1273 = vst [vmem:[%s2584_s30 + $0x18] sm:$0xff] %v1587_v12  ;;  %v1281_v10 = vsub.f32 %v1587_v12, %v2762_v45  ;;  %v1256_v11 = vpop.f32.mrb[4].mxu1 }
 0x25a   : > { %v1288_v46 = vmul.f32 %v1280_v13, %v1280_v13  ;;  %v1588_v60 = vadd.f32 %v1256_v11, %v760_v54  ;;  %v1258_v8 = vpop.f32.mrb[5].mxu1 }
 0x25b   : > { %v1289_v20 = vmul.f32 %v1281_v10, %v1281_v10  ;;  %v1589_v15 = vadd.f32 %v1258_v8, %v762_v51 }
 0x25c   : > { %v1294_v16 = vadd.f32 %v1288_v46, %v1286_v26  ;;  %1274 = vst [vmem:[%s2584_s30 + $0x20] sm:$0xff] %v1588_v60  ;;  %v1282_v23 = vsub.f32 %v1588_v60, %v2763_v18 }
 0x25d   : > { %v1303_v22 = vadd.f32 %v1289_v20, %v1287_v21  ;;  %1275 = vst [vmem:[%s2584_s30 + $0x28] sm:$0xff] %v1589_v15  ;;  %v1283_v32 = vsub.f32 %v1589_v15, %v2764_v33  ;;  %v1263_v59 = vpop.f32.mrb[6].mxu1 }
 0x25e   : > { %v1290_v49 = vmul.f32 %v1282_v23, %v1282_v23  ;;  %v1590_v2 = vadd.f32 %v1263_v59, %v767_v50  ;;  %v1265_v14 = vpop.f32.mrb[7].mxu1 }
 0x25f   : > { %v1291_v47 = vmul.f32 %v1283_v32, %v1283_v32  ;;  %v1591_v63 = vadd.f32 %v1265_v14, %v769_v42 }
 0x260   : > { %v1295_v27 = vadd.f32 %v1294_v16, %v1290_v49  ;;  %1276 = vst [vmem:[%s2584_s30 + $0x30] sm:$0xff] %v1590_v2  ;;  %v1284_v62 = vsub.f32 %v1590_v2, %v1643_v37 }
 0x261   : > { %v1304_v34 = vadd.f32 %v1303_v22, %v1291_v47  ;;  %1277 = vst [vmem:[%s2584_s30 + $0x38] sm:$0xff] %v1591_v63  ;;  %v1285_v28 = vsub.f32 %v1591_v63, %v1644_v35 }
 0x262   : > { %v1292_v48 = vmul.f32 %v1284_v62, %v1284_v62 }
 0x263   : > { %v1293_v58 = vmul.f32 %v1285_v28, %v1285_v28 }
 0x264   : > { %v1296_v53 = vadd.f32 %v1295_v27, %v1292_v48 }
 0x265   : > { %v1305_v17 = vadd.f32 %v1304_v34, %v1293_v58 }
 0x266   : > { %v1297_v6 = vrot.slane %v1296_v53, 4 }
 0x267   : > { %v1306_v19 = vrot.slane %v1305_v17, 4 }
 0x268   : > { %v1298_v0 = vadd.f32 %v1297_v6, %v1296_v53 }
 0x269   : > { %v1307_v40 = vadd.f32 %v1306_v19, %v1305_v17 }
 0x26a   : > { %v1299_v31 = vrot.slane %v1298_v0, 2 }
 0x26b   : > { %v1308_v41 = vrot.slane %v1307_v40, 2 }
 0x26c   : > { %v1300_v1 = vadd.f32 %v1299_v31, %v1298_v0 }
 0x26d   : > { %v1309_v3 = vadd.f32 %v1308_v41, %v1307_v40 }
 0x26e   : > { %v1301_v4 = vrot.slane %v1300_v1, 1 }
 0x26f   : > { %v1310_v5 = vrot.slane %v1309_v3, 1 }
 0x270   : > { %v1302_v61 = vadd.f32 %v1301_v4, %v1300_v1 }
 0x271   : > { %v1311_v54 = vadd.f32 %v1310_v5, %v1309_v3 }
 0x273   : > { %v1314_v51 = vcombine.low %v1302_v61, %v1311_v54  ;;  %39 = sbr.rel (!%p37_p0) target bundleno = 10 (0xa), region = 59 }
 0x275   : > { %v1321_v50 = vrot.slane %v1314_v51, %v2408_v55 }
 0x277   : > { %v1328_v42 = vrot.slane %v1321_v50, %v2408_v55 }
 0x279   : > { %1331 = vst.msk [vmem:[%s1330_s6] sm:$0x3] %vm2440_vm1, %v1328_v42 }
 0x27a   :  { %1656 = shalt.err (!%p1653_p5)
}
 0x27b   :  { %s1657_s12 = scalar_lea.hbm %s2657_s4, 64 }
 0x27c   :  { %p1658_p6 = scmp.ne.s32.totalorder %s2657_s4, %s1657_s12  ;;  %p1661_p7 = scmp.lt.u32.totalorder %s1657_s12, %s2657_s4 }
 0x27e   :  { %p1663_p8 = pnand %p1661_p7, %p1658_p6 }
 0x280   :  { %1666 = shalt.err (!%p1663_p8)
}
 0x281   :  { %s1728_s2 = smov 32   ;;  %s1729_s0 = smov 2  }
 0x282   :  { %1355 = dma.vmem_to_hbm [thread:$0]  %s1350_s8, 64, %s2657_s4, [#allocation5], %s1728_s2, %s1728_s2, %s1729_s0  }
 0x283   :  { %s1730_s19 = smov [#allocation2]  }
 0x284   :  { %s1337_s20 = sshll.u32 %s1730_s19, 4  ;;  %s1338_s20 = int_to_ptr.vmem [resolvable:$true] %s1337_s20 }
 0x285   :  { %s1667_s21 = scalar_lea.vmem %s1338_s20, 2048  ;;  %p1672_p10 = scmp.lt.s32.totalorder %s1338_s20, %s1338_s20 }
 0x286   :  { %p1668_p9 = scmp.ne.s32.totalorder %s1338_s20, %s1667_s21  ;;  %p1673_p11 = scmp.lt.s32.totalorder %s1667_s21, %s1667_s21 }
 0x288   :  { %p1674_p12 = por %p1673_p11, %p1672_p10 }
 0x28a   :  { %p1675_p13 = pnand %p1674_p12, %p1668_p9 }
 0x28c   :  { %1678 = shalt.err (!%p1675_p13)
}
 0x28d   :  { %s1679_s24 = scalar_lea.hbm %s2656_s3, 2048 }
 0x28e   :  { %p1680_p0 = scmp.ne.s32.totalorder %s2656_s3, %s1679_s24  ;;  %p1683_p1 = scmp.lt.u32.totalorder %s1679_s24, %s2656_s3 }
 0x290   :  { %p1685_p2 = pnand %p1683_p1, %p1680_p0 }
 0x292   :  { %1688 = shalt.err (!%p1685_p2)
}
 0x293   :  { %s1731_s27 = smov 256   ;;  %s1732_s28 = smov 16  }
 0x294   :  { %1343 = dma.vmem_to_hbm [thread:$0]  %s1338_s20, 2048, %s2656_s3, [#allocation3], %s1731_s27, %s1731_s27, %s1732_s28  }
 0x295   :  { %s1733_s6 = smov [#allocation6]  }
 0x296   :  { %s1361_s7 = sshll.u32 %s1733_s6, 4  ;;  %s1362_s7 = int_to_ptr.vmem [resolvable:$true] %s1361_s7 }
 0x297   :  { %s1689_s8 = scalar_lea.vmem %s1362_s7, 64  ;;  %p1694_p4 = scmp.lt.s32.totalorder %s1362_s7, %s1362_s7 }
 0x298   :  { %p1690_p3 = scmp.ne.s32.totalorder %s1362_s7, %s1689_s8  ;;  %p1695_p5 = scmp.lt.s32.totalorder %s1689_s8, %s1689_s8 }
 0x29a   :  { %p1696_p6 = por %p1695_p5, %p1694_p4 }
 0x29c   :  { %p1697_p7 = pnand %p1696_p6, %p1690_p3 }
 0x29e   :  { %1700 = shalt.err (!%p1697_p7)
}
 0x29f   :  { %s1701_s11 = scalar_lea.hbm %s2658_s5, 64 }
 0x2a0   :  { %p1702_p8 = scmp.ne.s32.totalorder %s2658_s5, %s1701_s11  ;;  %p1705_p9 = scmp.lt.u32.totalorder %s1701_s11, %s2658_s5 }
 0x2a2   :  { %p1707_p10 = pnand %p1705_p9, %p1702_p8 }
 0x2a4   :  { %1710 = shalt.err (!%p1707_p10)
}
 0x2a5   :  { %1367 = dma.vmem_to_hbm [thread:$0]  %s1362_s7, 64, %s2658_s5, [#allocation5], %s1728_s2, %s1728_s2, %s1729_s0  }
 0x2a6   :  { %1715 = dma.done.wait [#allocation3], 2048  }
 0x2a7   :  { %1716 = vsyncadd [#allocation3], 4294965248 }
 0x2a8   :  { %1717 = dma.done.wait [#allocation5], 128  }
 0x2a9   :  { %1718 = vsyncadd [#allocation5], 4294967168 }
 0x2aa   :  { %1377 = vsyncpa [#allocation3], 1 }
 0x2ab   :  { %1378 = vsyncpa [#allocation5], 1 }

</bundles_post_ra>
